<compile_context>
chip_gen: v7x
topology: tpu7x:2x2x1
jax: 0.10.0
libtpu: 0.0.40
codegen_flags: <defaults>
</compile_context>

<pallas_src>
import jax
import jax.numpy as jnp
from jax.experimental import pallas as pl
from jax.experimental.pallas import tpu as pltpu


def _plan_chunks(rows: int, row_bytes: int, max_chunks: int = 4,
                 min_chunk_bytes: int = 1 << 20):
    """Split `rows` into up to `max_chunks` contiguous (start, size) pieces.

    Only splits when each piece would carry at least ~1 MiB, so small arrays
    get a single DMA with no extra descriptor/semaphore overhead.
    """
    total_bytes = rows * row_bytes
    n_chunks = int(min(max_chunks, rows, max(1, total_bytes // min_chunk_bytes)))
    base, rem = divmod(rows, n_chunks)
    chunks, start = [], 0
    for i in range(n_chunks):
        size = base + (1 if i < rem else 0)
        chunks.append((start, size))
        start += size
    return chunks


def _make_identity_dma_kernel(chunks):
    """Kernel: issue one HBM->HBM async copy per (static) chunk, then wait all."""

    def kernel(x_hbm, o_hbm, sems):
        copies = []
        for i, (start, size) in enumerate(chunks):
            cp = pltpu.make_async_copy(
                x_hbm.at[pl.ds(start, size)],
                o_hbm.at[pl.ds(start, size)],
                sems.at[i],
            )
            cp.start()
            copies.append(cp)
        for cp in copies:
            cp.wait()

    return kernel


def identity(x: jax.Array, *, short_circuit: bool = False) -> jax.Array:
    """Identity forward pass.

    short_circuit=True returns x directly (zero HBM traffic, the true optimum).
    Otherwise the data is streamed through a direct HBM->HBM DMA in a Pallas
    kernel -- no VMEM staging, no per-step pipeline overhead.
    """
    if short_circuit or x.size == 0:
        return x

    orig_shape = x.shape
    n = x.size
    itemsize = jnp.dtype(x.dtype).itemsize

    # Metadata-only reshape to a 2-D view.  When the element count is a
    # multiple of 128 we pick a lane-dense column width (clean DMA descriptors
    # and natural chunk boundaries); otherwise the whole array is a single
    # contiguous (1, n) slab -- with no VMEM staging, raggedness costs nothing.
    cols = None
    for c in (1024, 512, 256, 128):
        if n % c == 0:
            cols = c
            break
    if cols is None:
        cols = n
    rows = n // cols
    x2d = x.reshape(rows, cols)

    chunks = _plan_chunks(rows, cols * itemsize)
    kernel = _make_identity_dma_kernel(chunks)

    out2d = pl.pallas_call(
        kernel,
        out_shape=jax.ShapeDtypeStruct((rows, cols), x.dtype),
        in_specs=[pl.BlockSpec(memory_space=pl.ANY)],   # raw HBM ref, no auto-DMA
        out_specs=pl.BlockSpec(memory_space=pl.ANY),    # raw HBM ref, no auto-DMA
        scratch_shapes=[pltpu.SemaphoreType.DMA((len(chunks),))],
        cost_estimate=pl.CostEstimate(
            flops=0,
            transcendentals=0,
            bytes_accessed=2 * n * itemsize,
        ),
    )(x2d)

    return out2d.reshape(orig_shape)


if __name__ == "__main__":
    key = jax.random.PRNGKey(0)
    # Small NCHW input consistent with a ResNet-style feature map.
    x = jax.random.normal(key, (2, 4, 16, 16), dtype=jnp.float32)

    # Kernel path (direct HBM->HBM DMA).
    y = identity(x)
    jax.block_until_ready(y)
    assert y.shape == x.shape, f"shape mismatch: {y.shape} vs {x.shape}"
    assert y.dtype == x.dtype, f"dtype mismatch: {y.dtype} vs {x.dtype}"
    assert jnp.array_equal(y, x), "identity output does not match input"

    # dtype-preservation check (bf16), same lane-friendly element count.
    xb = x.astype(jnp.bfloat16)
    yb = identity(xb)
    jax.block_until_ready(yb)
    assert yb.dtype == jnp.bfloat16
    assert jnp.array_equal(yb, xb), "bf16 identity output does not match input"

    # Short-circuit path (the true optimum for Identity: zero HBM traffic).
    ys = identity(x, short_circuit=True)
    assert ys is x

    print("KERNEL_OK")
</pallas_src>

<mosaic_0001>
module attributes {stable_mosaic.version = 11 : i64} {
  func.func @kernel(%arg0: memref<2x1024xf32, #tpu.memory_space<any>>, %arg1: memref<2x1024xf32, #tpu.memory_space<any>>, %arg2: memref<1x!tpu.dma_semaphore, #tpu.memory_space<semaphore_mem>>) attributes {dimension_semantics = [], scalar_prefetch = 0 : i64, scratch_operands = 1 : i64, tpu.core_type = #tpu.core_type<tc>} {
    %c0_i32 = arith.constant 0 : i32
    %c0_i32_0 = arith.constant 0 : i32
    %c0_i32_1 = arith.constant 0 : i32
    %0 = tpu.memref_slice %arg0[%c0_i32_0, %c0_i32_1] : memref<2x1024xf32, #tpu.memory_space<any>> -> memref<2x1024xf32, #tpu.memory_space<any>>
    %c0_i32_2 = arith.constant 0 : i32
    %c0_i32_3 = arith.constant 0 : i32
    %1 = tpu.memref_slice %arg1[%c0_i32_2, %c0_i32_3] : memref<2x1024xf32, #tpu.memory_space<any>> -> memref<2x1024xf32, #tpu.memory_space<any>>
    %2 = tpu.memref_slice %arg2[%c0_i32] : memref<1x!tpu.dma_semaphore, #tpu.memory_space<semaphore_mem>> -> memref<1x!tpu.dma_semaphore, #tpu.memory_space<semaphore_mem>>
    %3 = tpu.memref_squeeze %2 : memref<1x!tpu.dma_semaphore, #tpu.memory_space<semaphore_mem>> -> memref<!tpu.dma_semaphore, #tpu.memory_space<semaphore_mem>>
    tpu.enqueue_dma source(%0 : memref<2x1024xf32, #tpu.memory_space<any>>) target(%1 : memref<2x1024xf32, #tpu.memory_space<any>>) target_semaphore(%3 : memref<!tpu.dma_semaphore, #tpu.memory_space<semaphore_mem>>)
    %c0_i32_4 = arith.constant 0 : i32
    %c0_i32_5 = arith.constant 0 : i32
    %c0_i32_6 = arith.constant 0 : i32
    %4 = tpu.memref_slice %arg0[%c0_i32_5, %c0_i32_6] : memref<2x1024xf32, #tpu.memory_space<any>> -> memref<2x1024xf32, #tpu.memory_space<any>>
    %c0_i32_7 = arith.constant 0 : i32
    %c0_i32_8 = arith.constant 0 : i32
    %5 = tpu.memref_slice %arg1[%c0_i32_7, %c0_i32_8] : memref<2x1024xf32, #tpu.memory_space<any>> -> memref<2x1024xf32, #tpu.memory_space<any>>
    %6 = tpu.memref_slice %arg2[%c0_i32_4] : memref<1x!tpu.dma_semaphore, #tpu.memory_space<semaphore_mem>> -> memref<1x!tpu.dma_semaphore, #tpu.memory_space<semaphore_mem>>
    %7 = tpu.memref_squeeze %6 : memref<1x!tpu.dma_semaphore, #tpu.memory_space<semaphore_mem>> -> memref<!tpu.dma_semaphore, #tpu.memory_space<semaphore_mem>>
    tpu.wait_dma2 semaphore(%7 : memref<!tpu.dma_semaphore, #tpu.memory_space<semaphore_mem>>) src(%4 : memref<2x1024xf32, #tpu.memory_space<any>>) dst(%5 : memref<2x1024xf32, #tpu.memory_space<any>>)
    return
  }
}

</mosaic_0001>

<bundles_post_ra>
// kernel: tpu_custom_call.1
= control target key start
LH: loop header
LB: loop body
LE: loop exit
PB: predicated region body
PF: predicated region fallthrough
CT: control target
= control target key end

     0   :  { %s35_s6 = smov [#allocation2]   ;;  %s36_s7 = smov [#allocation3]   ;;  %s54_s0 = inlined_call_operand.hbm [shape: f32[2,1024], index: 0, kind: input, shape index: {}]   ;;  %s55_s1 = inlined_call_operand.hbm [shape: f32[2,1024], index: 1, kind: output, shape index: {}]  }
   0x1   :  { %s37_s8 = smov 0  }
   0x2   :  { %18 = dma.general %s54_s0, 256, %s55_s1, %s35_s6, %s36_s7, [#allocation4], %s37_s8, 0  }
   0x3   :  { %33 = dma.done.wait [#allocation2], 256 }
   0x4   :  { %34 = vsyncadd [#allocation2], 4294967040 }
   0x5   :  { %23 = vsyncmov [#allocation2] }
   0x8   :  { %s24_s13 = vpop.sfrf %23 }
   0x9   :  { %p29_p0 = scmp.ne.s32.totalorder %s24_s13, 0 }
   0xb   :  { %28 = shalt.err (%p29_p0)  }

</bundles_post_ra>
